<compile_context>
chip_gen: v7x
topology: tpu7x:2x2x1
jax: 0.10.0
libtpu: 0.0.40
codegen_flags: <defaults>
</compile_context>

<pallas_src>
import functools

import jax
import jax.numpy as jnp
from jax.experimental import pallas as pl
from jax.experimental.pallas import tpu as pltpu

EPS = 1e-5      # nn.BatchNorm2d default
LANE = 128
_MB = 1024 * 1024


def _round_up(x, m):
    return (x + m - 1) // m * m


def _cdiv(a, b):
    return -(-a // b)


def _vmem_limit_bytes():
    # ~3/4 of physical VMEM, capped at 100 MB (v5e/v6e: 96 MB, v7x: 48 MB).
    try:
        cap = pltpu.get_tpu_info().vmem_capacity_bytes
    except Exception:
        cap = 64 * _MB          # conservative fallback, valid on every chip
    return int(min(100 * _MB, cap * 3 // 4))


# -----------------------------------------------------------------------------
# Pallas kernels
# -----------------------------------------------------------------------------
def _matmul_stats_kernel(p_ref, w_ref, y_ref, s1_ref, s2_ref, acc_ref):
    """K-tiled  y = patches @ W  with per-M-tile BN partial sums.

    grid = (mt, kt): i = M tile ("parallel"), k = K tile ("arbitrary").
    acc_ref is an f32 VMEM accumulator resident across the K axis.
    """
    k = pl.program_id(1)

    @pl.when(k == 0)
    def _():
        acc_ref[...] = jnp.zeros_like(acc_ref)

    acc_ref[...] += jnp.dot(p_ref[...], w_ref[...],
                            preferred_element_type=jnp.float32)

    @pl.when(k == pl.num_programs(1) - 1)
    def _():
        y = acc_ref[...]                                  # f32 (tm, Np)
        y_ref[...] = y.astype(y_ref.dtype)                # bf16 inter-pass stream
        # Two separate lane-dense stores (no concatenate/relayout).
        s1_ref[...] = jnp.sum(y, axis=0, keepdims=True)[None]       # (1,1,Np)
        s2_ref[...] = jnp.sum(y * y, axis=0, keepdims=True)[None]   # (1,1,Np)


def _bn_relu_kernel(y_ref, s_ref, b_ref, o_ref):
    # out = relu(y * scale + bias); scale/bias fold gamma/mean/var, f32 math.
    y = y_ref[...].astype(jnp.float32)
    o_ref[...] = jnp.maximum(y * s_ref[...] + b_ref[...], 0.0).astype(o_ref.dtype)


def _bn_add_relu_kernel(y_ref, s_ref, b_ref, sc_ref, o_ref):
    y = y_ref[...].astype(jnp.float32)
    sc = sc_ref[...].astype(jnp.float32)
    o_ref[...] = jnp.maximum(y * s_ref[...] + b_ref[...] + sc,
                             0.0).astype(o_ref.dtype)


# -----------------------------------------------------------------------------
# pallas_call wrappers (tiled over M [+K], pipelined, megacore-parallel)
# -----------------------------------------------------------------------------
def _conv_matmul_stats(patches, w_mat, tile_m, tile_k):
    """Pass 1: K-tiled matmul + per-M-tile BN partial sums.  y is bf16."""
    Mp, Kp = patches.shape
    Np = w_mat.shape[1]
    mt = Mp // tile_m
    kt = Kp // tile_k
    cost = pl.CostEstimate(
        flops=2 * Mp * Kp * Np,
        transcendentals=0,
        bytes_accessed=(Mp * Kp * 2 + mt * Kp * Np * 2
                        + Mp * Np * 2 + 2 * mt * Np * 4),
    )
    return pl.pallas_call(
        _matmul_stats_kernel,
        out_shape=(
            jax.ShapeDtypeStruct((Mp, Np), jnp.bfloat16),      # y (bf16 stream)
            jax.ShapeDtypeStruct((mt, 1, Np), jnp.float32),    # per-tile sum
            jax.ShapeDtypeStruct((mt, 1, Np), jnp.float32),    # per-tile sum sq
        ),
        grid=(mt, kt),
        in_specs=[
            pl.BlockSpec((tile_m, tile_k), lambda i, k: (i, k)),
            pl.BlockSpec((tile_k, Np), lambda i, k: (k, 0)),
        ],
        out_specs=(
            pl.BlockSpec((tile_m, Np), lambda i, k: (i, 0)),
            pl.BlockSpec((1, 1, Np), lambda i, k: (i, 0, 0)),
            pl.BlockSpec((1, 1, Np), lambda i, k: (i, 0, 0)),
        ),
        scratch_shapes=[pltpu.VMEM((tile_m, Np), jnp.float32)],
        compiler_params=pltpu.CompilerParams(
            dimension_semantics=("parallel", "arbitrary"),
            vmem_limit_bytes=_vmem_limit_bytes(),
        ),
        cost_estimate=cost,
    )(patches, w_mat)


def _bn_relu_apply(y, scale, bias, shortcut, tile_m, out_dtype):
    """Pass 2: tiled affine (+ residual) + ReLU epilogue.  y/shortcut bf16."""
    Mp, Np = y.shape
    mt = Mp // tile_m
    in_specs = [
        pl.BlockSpec((tile_m, Np), lambda i: (i, 0)),
        pl.BlockSpec((1, Np), lambda i: (0, 0)),
        pl.BlockSpec((1, Np), lambda i: (0, 0)),
    ]
    args = [y, scale, bias]
    if shortcut is None:
        kernel = _bn_relu_kernel
        in_bytes = Mp * Np * 2
    else:
        kernel = _bn_add_relu_kernel
        in_specs.append(pl.BlockSpec((tile_m, Np), lambda i: (i, 0)))
        args.append(shortcut)
        in_bytes = 2 * Mp * Np * 2
    out_bytes = Mp * Np * jnp.dtype(out_dtype).itemsize
    cost = pl.CostEstimate(flops=4 * Mp * Np, transcendentals=0,
                           bytes_accessed=in_bytes + out_bytes + 2 * Np * 4)
    return pl.pallas_call(
        kernel,
        out_shape=jax.ShapeDtypeStruct((Mp, Np), out_dtype),
        grid=(mt,),
        in_specs=in_specs,
        out_specs=pl.BlockSpec((tile_m, Np), lambda i: (i, 0)),
        compiler_params=pltpu.CompilerParams(
            dimension_semantics=("parallel",),
            vmem_limit_bytes=_vmem_limit_bytes(),
        ),
        cost_estimate=cost,
    )(*args)


def _fused_conv_bn_relu(patches, w_mat, gamma_pad, beta_pad, m_true,
                        tile_m, tile_k, out_dtype, shortcut=None):
    """Conv (im2col matmul) + training-mode BN (+ residual) + ReLU."""
    Np = w_mat.shape[1]
    y, s1, s2 = _conv_matmul_stats(patches, w_mat, tile_m, tile_k)
    # Finalize BN stats from the tiny per-tile partials (cross-tile reduction).
    s1 = jnp.sum(s1, axis=(0, 1))                      # (Np,)
    s2 = jnp.sum(s2, axis=(0, 1))                      # (Np,)
    mean = s1 / m_true
    # TODO(synk): one-pass E[x^2]-E[x]^2 in f32 can lose precision when
    # mean^2 >> var; switch to a shifted/Welford-style combine if needed.
    var = jnp.maximum(s2 / m_true - mean * mean, 0.0)
    inv = jax.lax.rsqrt(var + EPS)
    scale = (gamma_pad * inv).reshape(1, Np)
    bias = (beta_pad - mean * gamma_pad * inv).reshape(1, Np)
    return _bn_relu_apply(y, scale, bias, shortcut, tile_m, out_dtype)


# -----------------------------------------------------------------------------
# Glue: im2col, weight reshape, padding, tiling choice, option-A shortcut
# -----------------------------------------------------------------------------
def _im2col_3x3(x_nhwc, stride):
    """3x3, pad=1 patches.  Returns (B*Ho*Wo, 9*C), Ho, Wo (tap-major cols)."""
    B, H, W, C = x_nhwc.shape
    xp = jnp.pad(x_nhwc, ((0, 0), (1, 1), (1, 1), (0, 0)))
    Ho = (H + 2 - 3) // stride + 1
    Wo = (W + 2 - 3) // stride + 1
    taps = []
    for ky in range(3):
        for kx in range(3):
            taps.append(
                xp[:, ky:ky + Ho * stride:stride, kx:kx + Wo * stride:stride, :])
    p = jnp.stack(taps, axis=3)                 # (B, Ho, Wo, 9, C)
    return p.reshape(B * Ho * Wo, 9 * C), Ho, Wo


def _w_to_mat(w_oihw):
    """PyTorch conv weight (Cout, Cin, 3, 3) -> (9*Cin, Cout), tap-major."""
    co, ci, kh, kw = w_oihw.shape
    return jnp.transpose(w_oihw, (2, 3, 1, 0)).reshape(kh * kw * ci, co)


def _pad2d(a, rows, cols):
    return jnp.pad(a, ((0, rows - a.shape[0]), (0, cols - a.shape[1])))


def _choose_m_tiling(M, tile_m):
    """Even tile count (v7x megacore), tile a multiple of 16 (bf16 sublane)."""
    mt = max(1, _cdiv(M, max(16, tile_m)))
    if mt > 1 and mt % 2:
        mt += 1
    tm = _round_up(_cdiv(M, mt), 16)
    return tm, mt * tm


def _choose_k_tiling(K, tile_k):
    """Lane-multiple K tile; bounds VMEM independent of 9*Cin (v7x-safe)."""
    Kp = _round_up(K, LANE)
    tk = min(_round_up(max(tile_k, LANE), LANE), Kp)
    kt = _cdiv(Kp, tk)
    return tk, kt * tk


def basic_block_light_forward(x_nchw, params, stride, option="A",
                              tile_m=512, tile_k=2048):
    """Forward of BasicBlock_Light (option 'A'), training-mode BatchNorm."""
    w1, g1, b1, w2, g2, b2 = (
        params["w1"], params["g1"], params["b1"],
        params["w2"], params["g2"], params["b2"],
    )
    in_planes = x_nchw.shape[1]
    planes = w1.shape[0]
    B = x_nchw.shape[0]

    # NHWC, bf16 activations for all MXU inputs and intermediate HBM streams.
    x = jnp.transpose(x_nchw, (0, 2, 3, 1)).astype(jnp.bfloat16)
    Np = _round_up(planes, LANE)                # lane-dense output channels

    # --- conv1 + bn1 + relu -------------------------------------------------
    # TODO(synk): im2col still materializes 9*Cin bytes/pixel in HBM; an
    # in-kernel halo-tiled 3x3 (9 shifted (tile,C)@(C,N) accumulations) would
    # cut patch traffic several-fold, esp. conv1 where small Cin pads K to 128.
    p1, Ho, Wo = _im2col_3x3(x, stride)
    M = B * Ho * Wo
    tm, Mp = _choose_m_tiling(M, tile_m)        # zero row-padding is BN-safe
    tk1, K1p = _choose_k_tiling(p1.shape[1], tile_k)

    p1p = _pad2d(p1, Mp, K1p)                                       # bf16
    w1m = _pad2d(_w_to_mat(w1), K1p, Np).astype(jnp.bfloat16)
    g1p = jnp.pad(g1.astype(jnp.float32), (0, Np - planes))
    b1p = jnp.pad(b1.astype(jnp.float32), (0, Np - planes))

    out1 = _fused_conv_bn_relu(p1p, w1m, g1p, b1p, float(M), tm, tk1,
                               jnp.bfloat16)                 # (Mp, Np) bf16
    out1_nhwc = out1[:M, :planes].reshape(B, Ho, Wo, planes)

    # --- shortcut (option 'A' LambdaLayer, or identity), bf16, lane-padded --
    if stride != 1 or in_planes != planes:
        if option != "A":
            # TODO(synk): option 'B' (1x1 conv + BN shortcut) not wired up.
            raise NotImplementedError("only option 'A' implemented")
        diff = planes - in_planes
        d1 = diff // 2
        d2 = diff - d1
        # ::2 subsampling matches the PyTorch LambdaLayer (hardcoded there too).
        sc = x[:, ::2, ::2, :] if stride != 1 else x
        sc = jnp.pad(sc, ((0, 0), (0, 0), (0, 0), (d1, d2 + Np - planes)))
    else:
        sc = jnp.pad(x, ((0, 0), (0, 0), (0, 0), (0, Np - planes)))
    sc_flat = _pad2d(sc.reshape(B * Ho * Wo, Np), Mp, Np)           # bf16

    # --- conv2 + bn2 + residual add + relu (final output f32) ---------------
    p2, _, _ = _im2col_3x3(out1_nhwc, 1)                            # bf16
    tk2, K2p = _choose_k_tiling(p2.shape[1], tile_k)
    p2p = _pad2d(p2, Mp, K2p)
    w2m = _pad2d(_w_to_mat(w2), K2p, Np).astype(jnp.bfloat16)
    g2p = jnp.pad(g2.astype(jnp.float32), (0, Np - planes))
    b2p = jnp.pad(b2.astype(jnp.float32), (0, Np - planes))

    out2 = _fused_conv_bn_relu(p2p, w2m, g2p, b2p, float(M), tm, tk2,
                               jnp.float32, shortcut=sc_flat)

    out = out2[:M, :planes].reshape(B, Ho, Wo, planes)
    return jnp.transpose(out, (0, 3, 1, 2)).astype(jnp.float32)     # -> NCHW


# -----------------------------------------------------------------------------
# Pure-JAX f32 reference (for correctness check)
# -----------------------------------------------------------------------------
def _ref_forward(x_nchw, params, stride, option="A"):
    w1, g1, b1, w2, g2, b2 = (
        params["w1"], params["g1"], params["b1"],
        params["w2"], params["g2"], params["b2"],
    )
    in_planes = x_nchw.shape[1]
    planes = w1.shape[0]
    x = jnp.transpose(x_nchw, (0, 2, 3, 1)).astype(jnp.float32)

    def conv(z, w, s):
        return jax.lax.conv_general_dilated(
            z, jnp.transpose(w, (2, 3, 1, 0)),
            window_strides=(s, s), padding=((1, 1), (1, 1)),
            dimension_numbers=("NHWC", "HWIO", "NHWC"),
        )

    def bn(z, g, b):
        m = jnp.mean(z, axis=(0, 1, 2), keepdims=True)
        v = jnp.mean((z - m) ** 2, axis=(0, 1, 2), keepdims=True)
        return (z - m) / jnp.sqrt(v + EPS) * g + b

    out = jax.nn.relu(bn(conv(x, w1, stride), g1, b1))
    out = bn(conv(out, w2, 1), g2, b2)

    if stride != 1 or in_planes != planes:
        diff = planes - in_planes
        d1 = diff // 2
        d2 = diff - d1
        sc = x[:, ::2, ::2, :] if stride != 1 else x
        sc = jnp.pad(sc, ((0, 0), (0, 0), (0, 0), (d1, d2)))
    else:
        sc = x
    out = jax.nn.relu(out + sc)
    return jnp.transpose(out, (0, 3, 1, 2))


def _make_params(key, in_planes, planes):
    k_w1, k_w2, k_g1, k_b1, k_g2, k_b2 = jax.random.split(key, 6)
    return {
        "w1": 0.1 * jax.random.normal(k_w1, (planes, in_planes, 3, 3), jnp.float32),
        "w2": 0.1 * jax.random.normal(k_w2, (planes, planes, 3, 3), jnp.float32),
        "g1": 1.0 + 0.1 * jax.random.normal(k_g1, (planes,), jnp.float32),
        "b1": 0.1 * jax.random.normal(k_b1, (planes,), jnp.float32),
        "g2": 1.0 + 0.1 * jax.random.normal(k_g2, (planes,), jnp.float32),
        "b2": 0.1 * jax.random.normal(k_b2, (planes,), jnp.float32),
    }


def _check(x, params, stride, tile_m, tile_k, tol):
    fwd = jax.jit(functools.partial(basic_block_light_forward,
                                    stride=stride, tile_m=tile_m, tile_k=tile_k))
    out = jax.block_until_ready(fwd(x, params))
    ref = jax.block_until_ready(_ref_forward(x, params, stride))
    assert out.shape == ref.shape, (out.shape, ref.shape)
    # Tolerance covers the bf16 MXU-input + bf16 intermediate-stream design
    # vs the all-f32 reference.
    err = float(jnp.max(jnp.abs(out - ref)))
    assert jnp.allclose(out, ref, rtol=tol, atol=tol), err
    return out


# -----------------------------------------------------------------------------
if __name__ == "__main__":
    key = jax.random.PRNGKey(0)
    k1, k2, k3, k4 = jax.random.split(key, 4)

    # Test 1: downsampling block (stride=2, option-A pad shortcut).
    # tile_m=64 -> 2 M-tiles: exercises the cross-tile BN-stat reduction and
    # the even-tile-count megacore split.
    B, in_planes, H, W, planes, stride = 2, 4, 16, 16, 8, 2
    x1 = jax.random.normal(k1, (B, in_planes, H, W), dtype=jnp.float32)
    p1 = _make_params(k2, in_planes, planes)
    out1 = _check(x1, p1, stride, tile_m=64, tile_k=2048, tol=5e-2)
    assert out1.shape == (B, planes, H // stride, W // stride)

    # Test 2: identity-shortcut block (stride=1, in_planes==planes) with a
    # small tile_k so the K-tiled accumulator path (kt=2) is exercised.
    B2, planes2, H2, W2 = 2, 16, 8, 8
    x2 = jax.random.normal(k3, (B2, planes2, H2, W2), dtype=jnp.float32)
    p2 = _make_params(k4, planes2, planes2)
    out2 = _check(x2, p2, stride=1, tile_m=64, tile_k=128, tol=5e-2)
    assert out2.shape == (B2, planes2, H2, W2)

    print("KERNEL_OK")
</pallas_src>

<mosaic_0001>
module attributes {stable_mosaic.version = 11 : i64} {
  func.func @_matmul_stats_kernel(%arg0: i32, %arg1: i32, %arg2: memref<64x128xbf16, #tpu.memory_space<vmem>>, %arg3: memref<128x128xbf16, #tpu.memory_space<vmem>>, %arg4: memref<64x128xbf16, #tpu.memory_space<vmem>>, %arg5: memref<1x1x128xf32, #tpu.memory_space<vmem>>, %arg6: memref<1x1x128xf32, #tpu.memory_space<vmem>>, %arg7: memref<64x128xf32, #tpu.memory_space<vmem>>) attributes {dimension_semantics = [#tpu.dimension_semantics<parallel>, #tpu.dimension_semantics<arbitrary>], iteration_bounds = array<i64: 2, 1>, scalar_prefetch = 0 : i64, scratch_operands = 1 : i64, tpu.core_type = #tpu.core_type<tc>, window_params = [{transform_indices = @transform_0, window_bounds = array<i64: 64, 128>}, {transform_indices = @transform_1, window_bounds = array<i64: 128, 128>}, {transform_indices = @transform_2, window_bounds = array<i64: 64, 128>}, {transform_indices = @transform_3, window_bounds = array<i64: 1, 1, 128>}, {transform_indices = @transform_4, window_bounds = array<i64: 1, 1, 128>}]} {
    %c0_i32 = arith.constant 0 : i32
    %0 = arith.cmpi eq, %arg1, %c0_i32 : i32
    %1 = arith.extui %0 : i1 to i32
    %c0_i32_0 = arith.constant 0 : i32
    %2 = arith.cmpi ne, %1, %c0_i32_0 : i32
    scf.if %2 {
      %cst_10 = arith.constant 0.000000e+00 : f32
      %12 = vector.broadcast %cst_10 : f32 to vector<64x128xf32>
      %c0_11 = arith.constant 0 : index
      %c0_12 = arith.constant 0 : index
      %13 = vector.load %arg7[%c0_11, %c0_12] : memref<64x128xf32, #tpu.memory_space<vmem>>, vector<64x128xf32>
      tpu.vector_store %arg7[%c0_11, %c0_12], %12 {strides = array<i32>} : memref<64x128xf32, #tpu.memory_space<vmem>>, vector<64x128xf32>,
    } else {
    }
    %c0 = arith.constant 0 : index
    %c0_1 = arith.constant 0 : index
    %3 = vector.load %arg7[%c0, %c0_1] : memref<64x128xf32, #tpu.memory_space<vmem>>, vector<64x128xf32>
    %c0_2 = arith.constant 0 : index
    %c0_3 = arith.constant 0 : index
    %4 = vector.load %arg2[%c0_2, %c0_3] : memref<64x128xbf16, #tpu.memory_space<vmem>>, vector<64x128xbf16>
    %c0_4 = arith.constant 0 : index
    %c0_5 = arith.constant 0 : index
    %5 = vector.load %arg3[%c0_4, %c0_5] : memref<128x128xbf16, #tpu.memory_space<vmem>>, vector<128x128xbf16>
    %cst = arith.constant dense<0.000000e+00> : vector<64x128xf32>
    %6 = tpu.matmul %4, %5, %cst {dimension_numbers = #tpu.dot_dimension_numbers<[1], [0], [0], [1], [0, 0, 1, 1], [], []>} : vector<64x128xbf16>, vector<128x128xbf16>, vector<64x128xf32> -> vector<64x128xf32>
    %7 = arith.addf %3, %6 : vector<64x128xf32>
    %c0_6 = arith.constant 0 : index
    %c0_7 = arith.constant 0 : index
    %8 = vector.load %arg7[%c0_6, %c0_7] : memref<64x128xf32, #tpu.memory_space<vmem>>, vector<64x128xf32>
    tpu.vector_store %arg7[%c0_6, %c0_7], %7 {strides = array<i32>} : memref<64x128xf32, #tpu.memory_space<vmem>>, vector<64x128xf32>,
    %c0_i32_8 = arith.constant 0 : i32
    %9 = arith.cmpi eq, %arg1, %c0_i32_8 : i32
    %10 = arith.extui %9 : i1 to i32
    %c0_i32_9 = arith.constant 0 : i32
    %11 = arith.cmpi ne, %10, %c0_i32_9 : i32
    scf.if %11 {
      %c0_10 = arith.constant 0 : index
      %c0_11 = arith.constant 0 : index
      %12 = vector.load %arg7[%c0_10, %c0_11] : memref<64x128xf32, #tpu.memory_space<vmem>>, vector<64x128xf32>
      %13 = arith.truncf %12 : vector<64x128xf32> to vector<64x128xbf16>
      %c0_12 = arith.constant 0 : index
      %c0_13 = arith.constant 0 : index
      %14 = vector.load %arg4[%c0_12, %c0_13] : memref<64x128xbf16, #tpu.memory_space<vmem>>, vector<64x128xbf16>
      tpu.vector_store %arg4[%c0_12, %c0_13], %13 {strides = array<i32>} : memref<64x128xbf16, #tpu.memory_space<vmem>>, vector<64x128xbf16>,
      %cst_14 = arith.constant dense<0.000000e+00> : vector<128xf32>
      %15 = vector.multi_reduction <add>, %12, %cst_14 [0] : vector<64x128xf32> to vector<128xf32>
      %16 = vector.shape_cast %15 : vector<128xf32> to vector<1x128xf32>
      %17 = vector.shape_cast %16 : vector<1x128xf32> to vector<1x1x128xf32>
      %c0_15 = arith.constant 0 : index
      %c0_16 = arith.constant 0 : index
      %c0_17 = arith.constant 0 : index
      %18 = vector.load %arg5[%c0_15, %c0_16, %c0_17] : memref<1x1x128xf32, #tpu.memory_space<vmem>>, vector<1x1x128xf32>
      tpu.vector_store %arg5[%c0_15, %c0_16, %c0_17], %17 {strides = array<i32>} : memref<1x1x128xf32, #tpu.memory_space<vmem>>, vector<1x1x128xf32>,
      %19 = arith.mulf %12, %12 : vector<64x128xf32>
      %cst_18 = arith.constant dense<0.000000e+00> : vector<128xf32>
      %20 = vector.multi_reduction <add>, %19, %cst_18 [0] : vector<64x128xf32> to vector<128xf32>
      %21 = vector.shape_cast %20 : vector<128xf32> to vector<1x128xf32>
      %22 = vector.shape_cast %21 : vector<1x128xf32> to vector<1x1x128xf32>
      %c0_19 = arith.constant 0 : index
      %c0_20 = arith.constant 0 : index
      %c0_21 = arith.constant 0 : index
      %23 = vector.load %arg6[%c0_19, %c0_20, %c0_21] : memref<1x1x128xf32, #tpu.memory_space<vmem>>, vector<1x1x128xf32>
      tpu.vector_store %arg6[%c0_19, %c0_20, %c0_21], %22 {strides = array<i32>} : memref<1x1x128xf32, #tpu.memory_space<vmem>>, vector<1x1x128xf32>,
    } else {
    }
    return
  }
  func.func @transform_0(%arg0: i32, %arg1: i32) -> (i32, i32) {
    %c0_i32 = arith.constant 0 : i32
    return %arg0, %arg1 : i32, i32
  }
  func.func @transform_1(%arg0: i32, %arg1: i32) -> (i32, i32) {
    %c0_i32 = arith.constant 0 : i32
    %c0_i32_0 = arith.constant 0 : i32
    return %arg1, %c0_i32 : i32, i32
  }
  func.func @transform_2(%arg0: i32, %arg1: i32) -> (i32, i32) {
    %c0_i32 = arith.constant 0 : i32
    %c0_i32_0 = arith.constant 0 : i32
    return %arg0, %c0_i32 : i32, i32
  }
  func.func @transform_3(%arg0: i32, %arg1: i32) -> (i32, i32, i32) {
    %c0_i32 = arith.constant 0 : i32
    %c0_i32_0 = arith.constant 0 : i32
    %c0_i32_1 = arith.constant 0 : i32
    return %arg0, %c0_i32, %c0_i32_0 : i32, i32, i32
  }
  func.func @transform_4(%arg0: i32, %arg1: i32) -> (i32, i32, i32) {
    %c0_i32 = arith.constant 0 : i32
    %c0_i32_0 = arith.constant 0 : i32
    %c0_i32_1 = arith.constant 0 : i32
    return %arg0, %c0_i32, %c0_i32_0 : i32, i32, i32
  }
}

module attributes {stable_mosaic.version = 11 : i64} {
  func.func @_bn_relu_kernel(%arg0: i32, %arg1: memref<64x128xbf16, #tpu.memory_space<vmem>>, %arg2: memref<1x128xf32, #tpu.memory_space<vmem>>, %arg3: memref<1x128xf32, #tpu.memory_space<vmem>>, %arg4: memref<64x128xbf16, #tpu.memory_space<vmem>>) attributes {dimension_semantics = [#tpu.dimension_semantics<parallel>], iteration_bounds = array<i64: 2>, scalar_prefetch = 0 : i64, scratch_operands = 0 : i64, tpu.core_type = #tpu.core_type<tc>, window_params = [{transform_indices = @transform_0, window_bounds = array<i64: 64, 128>}, {pipeline_mode = #tpu.pipeline_mode<synchronous>, transform_indices = @transform_1, window_bounds = array<i64: 1, 128>}, {pipeline_mode = #tpu.pipeline_mode<synchronous>, transform_indices = @transform_2, window_bounds = array<i64: 1, 128>}, {transform_indices = @transform_3, window_bounds = array<i64: 64, 128>}]} {
    %c0 = arith.constant 0 : index
    %c0_0 = arith.constant 0 : index
    %0 = vector.load %arg1[%c0, %c0_0] : memref<64x128xbf16, #tpu.memory_space<vmem>>, vector<64x128xbf16>
    %1 = arith.extf %0 : vector<64x128xbf16> to vector<64x128xf32>
    %c0_1 = arith.constant 0 : index
    %c0_2 = arith.constant 0 : index
    %2 = vector.load %arg2[%c0_1, %c0_2] : memref<1x128xf32, #tpu.memory_space<vmem>>, vector<1x128xf32>
    %3 = vector.broadcast %2 : vector<1x128xf32> to vector<64x128xf32>
    %4 = arith.mulf %1, %3 : vector<64x128xf32>
    %c0_3 = arith.constant 0 : index
    %c0_4 = arith.constant 0 : index
    %5 = vector.load %arg3[%c0_3, %c0_4] : memref<1x128xf32, #tpu.memory_space<vmem>>, vector<1x128xf32>
    %6 = vector.broadcast %5 : vector<1x128xf32> to vector<64x128xf32>
    %7 = arith.addf %4, %6 : vector<64x128xf32>
    %cst = arith.constant 0.000000e+00 : f32
    %8 = vector.broadcast %cst : f32 to vector<64x128xf32>
    %9 = arith.maximumf %7, %8 : vector<64x128xf32>
    %10 = arith.truncf %9 : vector<64x128xf32> to vector<64x128xbf16>
    %c0_5 = arith.constant 0 : index
    %c0_6 = arith.constant 0 : index
    %11 = vector.load %arg4[%c0_5, %c0_6] : memref<64x128xbf16, #tpu.memory_space<vmem>>, vector<64x128xbf16>
    tpu.vector_store %arg4[%c0_5, %c0_6], %10 {strides = array<i32>} : memref<64x128xbf16, #tpu.memory_space<vmem>>, vector<64x128xbf16>,
    return
  }
  func.func @transform_0(%arg0: i32) -> (i32, i32) {
    %c0_i32 = arith.constant 0 : i32
    %c0_i32_0 = arith.constant 0 : i32
    return %arg0, %c0_i32 : i32, i32
  }
  func.func @transform_1(%arg0: i32) -> (i32, i32) {
    %c0_i32 = arith.constant 0 : i32
    %c0_i32_0 = arith.constant 0 : i32
    %c0_i32_1 = arith.constant 0 : i32
    return %c0_i32, %c0_i32_0 : i32, i32
  }
  func.func @transform_2(%arg0: i32) -> (i32, i32) {
    %c0_i32 = arith.constant 0 : i32
    %c0_i32_0 = arith.constant 0 : i32
    %c0_i32_1 = arith.constant 0 : i32
    return %c0_i32, %c0_i32_0 : i32, i32
  }
  func.func @transform_3(%arg0: i32) -> (i32, i32) {
    %c0_i32 = arith.constant 0 : i32
    %c0_i32_0 = arith.constant 0 : i32
    return %arg0, %c0_i32 : i32, i32
  }
}

module attributes {stable_mosaic.version = 11 : i64} {
  func.func @_bn_add_relu_kernel(%arg0: i32, %arg1: memref<64x128xbf16, #tpu.memory_space<vmem>>, %arg2: memref<1x128xf32, #tpu.memory_space<vmem>>, %arg3: memref<1x128xf32, #tpu.memory_space<vmem>>, %arg4: memref<64x128xbf16, #tpu.memory_space<vmem>>, %arg5: memref<64x128xf32, #tpu.memory_space<vmem>>) attributes {dimension_semantics = [#tpu.dimension_semantics<parallel>], iteration_bounds = array<i64: 2>, scalar_prefetch = 0 : i64, scratch_operands = 0 : i64, tpu.core_type = #tpu.core_type<tc>, window_params = [{transform_indices = @transform_0, window_bounds = array<i64: 64, 128>}, {pipeline_mode = #tpu.pipeline_mode<synchronous>, transform_indices = @transform_1, window_bounds = array<i64: 1, 128>}, {pipeline_mode = #tpu.pipeline_mode<synchronous>, transform_indices = @transform_2, window_bounds = array<i64: 1, 128>}, {transform_indices = @transform_3, window_bounds = array<i64: 64, 128>}, {transform_indices = @transform_4, window_bounds = array<i64: 64, 128>}]} {
    %c0 = arith.constant 0 : index
    %c0_0 = arith.constant 0 : index
    %0 = vector.load %arg1[%c0, %c0_0] : memref<64x128xbf16, #tpu.memory_space<vmem>>, vector<64x128xbf16>
    %1 = arith.extf %0 : vector<64x128xbf16> to vector<64x128xf32>
    %c0_1 = arith.constant 0 : index
    %c0_2 = arith.constant 0 : index
    %2 = vector.load %arg4[%c0_1, %c0_2] : memref<64x128xbf16, #tpu.memory_space<vmem>>, vector<64x128xbf16>
    %3 = arith.extf %2 : vector<64x128xbf16> to vector<64x128xf32>
    %c0_3 = arith.constant 0 : index
    %c0_4 = arith.constant 0 : index
    %4 = vector.load %arg2[%c0_3, %c0_4] : memref<1x128xf32, #tpu.memory_space<vmem>>, vector<1x128xf32>
    %5 = vector.broadcast %4 : vector<1x128xf32> to vector<64x128xf32>
    %6 = arith.mulf %1, %5 : vector<64x128xf32>
    %c0_5 = arith.constant 0 : index
    %c0_6 = arith.constant 0 : index
    %7 = vector.load %arg3[%c0_5, %c0_6] : memref<1x128xf32, #tpu.memory_space<vmem>>, vector<1x128xf32>
    %8 = vector.broadcast %7 : vector<1x128xf32> to vector<64x128xf32>
    %9 = arith.addf %6, %8 : vector<64x128xf32>
    %10 = arith.addf %9, %3 : vector<64x128xf32>
    %cst = arith.constant 0.000000e+00 : f32
    %11 = vector.broadcast %cst : f32 to vector<64x128xf32>
    %12 = arith.maximumf %10, %11 : vector<64x128xf32>
    %c0_7 = arith.constant 0 : index
    %c0_8 = arith.constant 0 : index
    %13 = vector.load %arg5[%c0_7, %c0_8] : memref<64x128xf32, #tpu.memory_space<vmem>>, vector<64x128xf32>
    tpu.vector_store %arg5[%c0_7, %c0_8], %12 {strides = array<i32>} : memref<64x128xf32, #tpu.memory_space<vmem>>, vector<64x128xf32>,
    return
  }
  func.func @transform_0(%arg0: i32) -> (i32, i32) {
    %c0_i32 = arith.constant 0 : i32
    %c0_i32_0 = arith.constant 0 : i32
    return %arg0, %c0_i32 : i32, i32
  }
  func.func @transform_1(%arg0: i32) -> (i32, i32) {
    %c0_i32 = arith.constant 0 : i32
    %c0_i32_0 = arith.constant 0 : i32
    %c0_i32_1 = arith.constant 0 : i32
    return %c0_i32, %c0_i32_0 : i32, i32
  }
  func.func @transform_2(%arg0: i32) -> (i32, i32) {
    %c0_i32 = arith.constant 0 : i32
    %c0_i32_0 = arith.constant 0 : i32
    %c0_i32_1 = arith.constant 0 : i32
    return %c0_i32, %c0_i32_0 : i32, i32
  }
  func.func @transform_3(%arg0: i32) -> (i32, i32) {
    %c0_i32 = arith.constant 0 : i32
    %c0_i32_0 = arith.constant 0 : i32
    return %arg0, %c0_i32 : i32, i32
  }
  func.func @transform_4(%arg0: i32) -> (i32, i32) {
    %c0_i32 = arith.constant 0 : i32
    %c0_i32_0 = arith.constant 0 : i32
    return %arg0, %c0_i32 : i32, i32
  }
}

</mosaic_0001>

<bundles_post_ra>
// kernel: basic_block_light_forward.5
= control target key start
LH: loop header
LB: loop body
LE: loop exit
PB: predicated region body
PF: predicated region fallthrough
CT: control target
= control target key end

     0   :  { %s431_s12 = smov 0   ;;  %s461_s0 = inlined_call_operand.vmem [shape: bf16[128,128], index: 0, kind: input, shape index: {}]   ;;  %s462_s1 = inlined_call_operand.vmem [shape: f32[1,128], index: 1, kind: input, shape index: {}]   ;;  %s463_s2 = inlined_call_operand.vmem [shape: f32[1,128], index: 2, kind: input, shape index: {}]   ;;  %s464_s3 = inlined_call_operand.vmem [shape: bf16[128,128], index: 3, kind: output, shape index: {}]  }
   0x1 LB: > { %s324_s13 = sadd.s32 4294967295, %s409_s12   ;;  %p328_p0 = scmp.ge.s32.totalorder %s409_s12, 1  ;;  %s409_s12 = sphi %s431_s12, %s13_s12  }
   0x2   : > { %p138_p1 = scmp.lt.s32.totalorder %s409_s12, 3 }
   0x4   : > { %p139_p2 = pnand %p328_p0, %p138_p1 }
   0x5   : > { %s329_s14 = sshll.u32 (!%p139_p2), %s324_s13, 3  ;;  %v333_v0 = vld [vmem:[%s462_s1] ss:$0 sm:$0xff] (!%p139_p2) }
   0x6   : > { %142 = sbr.rel (%p139_p2) target bundleno = 29 (0x1d), region = 32  ;;  %p163_p3 = scmp.lt.s32.totalorder (!%p139_p2), %s329_s14, 15  ;;  %v334_v9 = vld [vmem:[%s463_s2] ss:$0 sm:$0xff] (!%p139_p2) }
   0xd   : > { %s466_s14 = smov (!%p163_p3, %s329_s14), 15 }
   0xe   : > { %s330_s15 = sshll.u32 %s466_s14, 2 }
   0xf   : > { %s166_s18 = scalar_lea.vmem %s461_s0, %s330_s15  ;;  %s172_s25 = scalar_lea.vmem %s464_s3, %s330_s15 }
  0x10   : > { %v354_v1 = vld [vmem:[%s166_s18] sm:$0xff]   ;;  %v389_v2 = vld [vmem:[%s166_s18 + $0x8] sm:$0xff]   ;;  %v390_v3 = vld [vmem:[%s166_s18 + $0x10] sm:$0xff]  }
  0x11   : > { %v355_v4 = vunpack.c.l.bf16 %v354_v1  ;;  %v356_v5 = vunpack.c.h.bf16 %v354_v1  ;;  %v359_v6 = vunpack.c.l.bf16 %v389_v2  ;;  %v360_v7 = vunpack.c.h.bf16 %v389_v2  ;;  %v391_v8 = vld [vmem:[%s166_s18 + $0x18] sm:$0xff]  }
  0x12   : > { %v363_v10 = vunpack.c.l.bf16 %v390_v3  ;;  %v364_v11 = vunpack.c.h.bf16 %v390_v3  ;;  %v367_v12 = vunpack.c.l.bf16 %v391_v8  ;;  %v368_v13 = vunpack.c.h.bf16 %v391_v8 }
  0x13   : > { %v197_v14 = vmul.f32 %v355_v4, %v333_v0  ;;  %v198_v15 = vmul.f32 %v356_v5, %v333_v0  ;;  %v199_v16 = vmul.f32 %v359_v6, %v333_v0  ;;  %v200_v17 = vmul.f32 %v360_v7, %v333_v0 }
  0x14   : > { %v201_v18 = vmul.f32 %v363_v10, %v333_v0  ;;  %v202_v19 = vmul.f32 %v364_v11, %v333_v0  ;;  %v203_v20 = vmul.f32 %v367_v12, %v333_v0  ;;  %v204_v21 = vmul.f32 %v368_v13, %v333_v0 }
  0x15   : > { %v212_v22 = vadd.f32 %v334_v9, %v197_v14  ;;  %v213_v23 = vadd.f32 %v334_v9, %v198_v15  ;;  %v214_v24 = vadd.f32 %v334_v9, %v199_v16  ;;  %v215_v25 = vadd.f32 %v334_v9, %v200_v17 }
  0x16   : > { %v216_v26 = vadd.f32 %v334_v9, %v201_v18  ;;  %v217_v27 = vadd.f32 %v334_v9, %v202_v19  ;;  %v218_v28 = vadd.f32 %v334_v9, %v203_v20  ;;  %v219_v29 = vadd.f32 %v334_v9, %v204_v21 }
  0x17   : > { %v220_v30 = vmax.f32 %v212_v22, 0.0  ;;  %v221_v31 = vmax.f32 %v213_v23, 0.0  ;;  %v222_v32 = vmax.f32 %v214_v24, 0.0  ;;  %v223_v33 = vmax.f32 %v215_v25, 0.0 }
  0x18   : > { %v224_v34 = vmax.f32 %v216_v26, 0.0  ;;  %v225_v35 = vmax.f32 %v217_v27, 0.0  ;;  %v226_v36 = vmax.f32 %v218_v28, 0.0  ;;  %v227_v37 = vmax.f32 %v219_v29, 0.0 }
  0x19   : > { %v372_v38 = vpack.c.bf16 %v221_v31, %v220_v30  ;;  %v377_v39 = vpack.c.bf16 %v223_v33, %v222_v32 }
  0x1a   : > { %v382_v40 = vpack.c.bf16 %v225_v35, %v224_v34  ;;  %v387_v41 = vpack.c.bf16 %v227_v37, %v226_v36 }
  0x1b   : > { %373 = vst [vmem:[%s172_s25] sm:$0xff] %v372_v38   ;;  %392 = vst [vmem:[%s172_s25 + $0x8] sm:$0xff] %v377_v39  }
  0x1c   : > { %393 = vst [vmem:[%s172_s25 + $0x10] sm:$0xff] %v382_v40   ;;  %394 = vst [vmem:[%s172_s25 + $0x18] sm:$0xff] %v387_v41  }
  0x1d PF: > { %s13_s12 = sadd.s32 1, %s409_s12  }
  0x1e   : > { %p10_p4 = scmp.ge.s32.totalorder %s13_s12, 4  }
  0x20   :  { %12 = sbr.rel (!%p10_p4) target bundleno = 1 (0x1), region = 62 }

// kernel: basic_block_light_forward.4
= control target key start
LH: loop header
LB: loop body
LE: loop exit
PB: predicated region body
PF: predicated region fallthrough
CT: control target
= control target key end

     0   :  { %s881_s15 = smov 0   ;;  %s883_s16 = smov 0   ;;  %s962_s0 = inlined_call_operand.vmem [shape: bf16[128,128], index: 0, kind: input, shape index: {}]   ;;  %s963_s1 = inlined_call_operand.vmem [shape: bf16[128,128], index: 1, kind: input, shape index: {}]   ;;  %s964_s2 = inlined_call_operand.vmem [shape: bf16[128,128], index: 2, kind: output, shape index: {0}]   ;;  %s965_s3 = inlined_call_operand.vmem [shape: f32[2,1,128], index: 3, kind: output, shape index: {1}]   ;;  %s966_s4 = inlined_call_operand.vmem [shape: f32[2,1,128], index: 4, kind: output, shape index: {2}]  }
   0x1   :  { %s885_s17 = smov 0  }
   0x2 LB: > { %s27_s18 = sadd.s32 1, %s850_s16  ;;  %p686_p0 = scmp.ge.s32.totalorder %s854_s17, 1  ;;  %s854_s17 = sphi %s885_s17, %s15_s17   ;;  %s850_s16 = sphi %s883_s16, %s968_s16   ;;  %s846_s15 = sphi %s881_s15, %s967_s15  }
   0x3   : > { %p29_p1 = scmp.ge.s32.totalorder %s27_s18, 2  ;;  %p196_p2 = scmp.lt.s32.totalorder %s854_s17, 3 }
   0x5   : > { %s970_s18 = smov (%p29_p1, %s27_s18), 0  ;;  %p197_p3 = pnand %p686_p0, %p196_p2 }
   0x6   : > { %v820_v0 = vld [vmem:[%s963_s1] sm:$0xff] (!%p197_p3)   ;;  %s687_s21 = sshll.u32 (!%p197_p3), %s846_s15, 3  ;;  %v821_v1 = vld [vmem:[%s963_s1 + $0x8] sm:$0xff] (!%p197_p3)   ;;  %v822_v2 = vld [vmem:[%s963_s1 + $0x10] sm:$0xff] (!%p197_p3)   ;;  %p257_p5 = scmp.lt.s32.totalorder (!%p197_p3), %s846_s15, 1 }
   0x7   : > { %200 = sbr.rel (%p197_p3) target bundleno = 283 (0x11b), region = 28  ;;  %p237_p4 = scmp.lt.s32.totalorder (!%p197_p3), %s687_s21, 15  ;;  %756 = vmatprep.subr.bf16.mxu0 (!%p197_p3), %v820_v0  ;;  %780 = vmatprep.subr.bf16.mxu1 (!%p197_p3), %v820_v0  ;;  %v823_v3 = vld [vmem:[%s963_s1 + $0x18] sm:$0xff] (!%p197_p3)   ;;  %v824_v6 = vld [vmem:[%s963_s1 + $0x20] sm:$0xff] (!%p197_p3)   ;;  %v825_v7 = vld [vmem:[%s963_s1 + $0x28] sm:$0xff] (!%p197_p3)  }
   0x8   : > { %757 = vmatpush3.bf16.msra.mxu0 (!%p197_p3), %v820_v0  ;;  %788 = vmatpush3.bf16.msra.mxu1 (!%p197_p3), %v820_v0  ;;  %v826_v8 = vld [vmem:[%s963_s1 + $0x30] sm:$0xff] (!%p197_p3)   ;;  %v827_v9 = vld [vmem:[%s963_s1 + $0x38] sm:$0xff] (!%p197_p3)  }
   0x9   : > { %758 = vmatprep.subr.bf16.mxu0 (!%p197_p3), %v821_v1  ;;  %781 = vmatprep.subr.bf16.mxu1 (!%p197_p3), %v821_v1 }
   0xc   : > { %759 = vmatpush3.bf16.msra.mxu0 (!%p197_p3), %v821_v1  ;;  %789 = vmatpush3.bf16.msra.mxu1 (!%p197_p3), %v821_v1 }
   0xd   : > { %760 = vmatprep.subr.bf16.mxu0 (!%p197_p3), %v822_v2  ;;  %782 = vmatprep.subr.bf16.mxu1 (!%p197_p3), %v822_v2 }
   0xe   : > { %s972_s21 = smov (!%p237_p4, %s687_s21), 15  ;;  %s974_s15 = smov (!%p257_p5, %s846_s15), 1 }
   0xf   : > { %s688_s26 = sshll.u32 %s972_s21, 2  ;;  %s259_s23 = scalar_lea.vmem %s965_s3, %s974_s15 }
  0x10   : > { %s919_s29 = scalar_lea.vmem %s962_s0, %s688_s26  ;;  %761 = vmatpush3.bf16.msra.mxu0 %v822_v2  ;;  %790 = vmatpush3.bf16.msra.mxu1 %v822_v2  ;;  %s255_s20 = scalar_lea.vmem %s964_s2, %s688_s26 }
  0x11   : > { %v828_v4 = vld [vmem:[%s919_s29] sm:$0xff]   ;;  %v830_v5 = vld [vmem:[%s919_s29 + $0x10] sm:$0xff]   ;;  %762 = vmatprep.subr.bf16.mxu0 %v823_v3  ;;  %783 = vmatprep.subr.bf16.mxu1 %v823_v3  ;;  %v829_v10 = vld [vmem:[%s919_s29 + $0x8] sm:$0xff]   ;;  %s262_s26 = scalar_lea.vmem %s966_s4, %s974_s15 }
  0x12   : > { %772 = vmatprep.mubr.bf16.mxu0 %v828_v4  ;;  %776 = vmatprep.mubr.bf16.mxu1 %v830_v5  ;;  %v831_v11 = vld [vmem:[%s919_s29 + $0x18] sm:$0xff]  }
  0x14   : > { %763 = vmatpush3.bf16.msra.mxu0 %v823_v3  ;;  %791 = vmatpush3.bf16.msra.mxu1 %v823_v3 }
  0x15   : > { %764 = vmatprep.subr.bf16.mxu0 %v824_v6  ;;  %784 = vmatprep.subr.bf16.mxu1 %v824_v6 }
  0x18   : > { %765 = vmatpush3.bf16.msra.mxu0 %v824_v6  ;;  %792 = vmatpush3.bf16.msra.mxu1 %v824_v6 }
  0x19   : > { %766 = vmatprep.subr.bf16.mxu0 %v825_v7  ;;  %785 = vmatprep.subr.bf16.mxu1 %v825_v7 }
  0x1c   : > { %767 = vmatpush3.bf16.msra.mxu0 %v825_v7  ;;  %793 = vmatpush3.bf16.msra.mxu1 %v825_v7 }
  0x1d   : > { %768 = vmatprep.subr.bf16.mxu0 %v826_v8  ;;  %786 = vmatprep.subr.bf16.mxu1 %v826_v8 }
  0x20   : > { %769 = vmatpush3.bf16.msra.mxu0 %v826_v8  ;;  %794 = vmatpush3.bf16.msra.mxu1 %v826_v8 }
  0x21   : > { %770 = vmatprep.subr.bf16.mxu0 %v827_v9  ;;  %787 = vmatprep.subr.bf16.mxu1 %v827_v9 }
  0x24   : > { %771 = vmatpush3.bf16.msra.mxu0 %v827_v9  ;;  %795 = vmatpush3.bf16.msra.mxu1 %v827_v9 }
  0x27   : > { %773 = vmatmul.mubr.bf16.vlgmr.msra.gmra.mrb[0].mxu0 %v829_v10  ;;  %777 = vmatmul.mubr.bf16.vlgmr.msra.gmra.mrb[0].mxu1 %v831_v11 }
  0xfa   : > { %v774_v12 = vpop.f32.mrb[0].mxu0  ;;  %v778_v13 = vpop.f32.mrb[0].mxu1 }
  0xfb   : > { %v414_v14 = vpop.f32.mrb[1].mxu0  ;;  %v430_v15 = vpop.f32.mrb[1].mxu1  ;;  %v528_v27 = vmul.f32 %v774_v12, %v774_v12  ;;  %v532_v39 = vmul.f32 %v778_v13, %v778_v13 }
  0xfc   : > { %v775_v16 = vpop.f32.mrb[2].mxu0  ;;  %v779_v17 = vpop.f32.mrb[2].mxu1  ;;  %v526_v18 = vmul.f32 %v414_v14, %v414_v14  ;;  %v530_v33 = vmul.f32 %v430_v15, %v430_v15 }
  0xfd   : > { %v729_v19 = vpack.c.bf16 %v775_v16, %v774_v12  ;;  %v417_v20 = vpop.f32.mrb[3].mxu0  ;;  %v739_v21 = vpack.c.bf16 %v779_v17, %v778_v13  ;;  %v433_v22 = vpop.f32.mrb[3].mxu1  ;;  %v529_v30 = vmul.f32 %v775_v16, %v775_v16  ;;  %v533_v42 = vmul.f32 %v779_v17, %v779_v17 }
  0xfe   : > { %v724_v23 = vpack.c.bf16 %v417_v20, %v414_v14  ;;  %v512_v24 = vadd.f32 %v417_v20, %v414_v14  ;;  %v527_v25 = vmul.f32 %v417_v20, %v417_v20  ;;  %v734_v26 = vpack.c.bf16 %v433_v22, %v430_v15 }
  0xff   : > { %741 = vst [vmem:[%s255_s20 + $0x8] sm:$0xff] %v729_v19   ;;  %743 = vst [vmem:[%s255_s20 + $0x18] sm:$0xff] %v739_v21   ;;  %v531_v38 = vmul.f32 %v433_v22, %v433_v22 }
 0x100   : > { %725 = vst [vmem:[%s255_s20] sm:$0xff] %v724_v23   ;;  %v513_v28 = vadd.f32 %v774_v12, %v512_v24  ;;  %v534_v29 = vadd.f32 %v527_v25, %v526_v18  ;;  %742 = vst [vmem:[%s255_s20 + $0x10] sm:$0xff] %v734_v26  }
 0x102   : > { %v535_v31 = vadd.f32 %v534_v29, %v528_v27  ;;  %v514_v32 = vadd.f32 %v775_v16, %v513_v28 }
 0x104   : > { %v515_v34 = vadd.f32 %v514_v32, %v430_v15  ;;  %v536_v35 = vadd.f32 %v535_v31, %v529_v30 }
 0x106   : > { %v537_v36 = vadd.f32 %v536_v35, %v530_v33  ;;  %v516_v37 = vadd.f32 %v515_v34, %v433_v22 }
 0x108   : > { %v517_v40 = vadd.f32 %v778_v13, %v516_v37  ;;  %v538_v41 = vadd.f32 %v537_v36, %v531_v38 }
 0x10a   : > { %v518_v43 = vadd.f32 %v779_v17, %v517_v40  ;;  %v539_v44 = vadd.f32 %v538_v41, %v532_v39 }
 0x10c   : > { %v519_v45 = vrot.slane %v518_v43, 4  ;;  %v540_v46 = vadd.f32 %v539_v44, %v533_v42 }
 0x10e   : > { %v520_v47 = vadd.f32 %v519_v45, %v518_v43  ;;  %v541_v48 = vrot.slane %v540_v46, 4 }
 0x110   : > { %v521_v49 = vrot.slane %v520_v47, 2  ;;  %v542_v50 = vadd.f32 %v541_v48, %v540_v46 }
 0x112   : > { %v522_v51 = vadd.f32 %v521_v49, %v520_v47  ;;  %v543_v52 = vrot.slane %v542_v50, 2 }
 0x114   : > { %v523_v53 = vrot.slane %v522_v51, 1  ;;  %v544_v54 = vadd.f32 %v543_v52, %v542_v50 }
 0x116   : > { %v524_v55 = vadd.f32 %v523_v53, %v522_v51  ;;  %v545_v56 = vrot.slane %v544_v54, 1 }
 0x118   : > { %525 = vst [vmem:[%s259_s23] sm:$0x1] %v524_v55  ;;  %v546_v57 = vadd.f32 %v545_v56, %v544_v54 }
 0x11a   : > { %547 = vst [vmem:[%s262_s26] sm:$0x1] %v546_v57 }
 0x11b PF: > { %s15_s17 = sadd.s32 1, %s854_s17   ;;  %s967_s15 = smov %s850_s16 }
 0x11c   : > { %p12_p6 = scmp.ge.s32.totalorder %s15_s17, 4   ;;  %s968_s16 = smov %s970_s18 }
 0x11e   :  { %14 = sbr.rel (!%p12_p6) target bundleno = 2 (0x2), region = 93 }

// kernel: basic_block_light_forward.7
= control target key start
LH: loop header
LB: loop body
LE: loop exit
PB: predicated region body
PF: predicated region fallthrough
CT: control target
= control target key end

     0   :  { %s471_s15 = smov 0   ;;  %s501_s0 = inlined_call_operand.vmem [shape: bf16[128,128], index: 0, kind: input, shape index: {}]   ;;  %s502_s1 = inlined_call_operand.vmem [shape: f32[1,128], index: 1, kind: input, shape index: {}]   ;;  %s503_s2 = inlined_call_operand.vmem [shape: f32[1,128], index: 2, kind: input, shape index: {}]   ;;  %s504_s3 = inlined_call_operand.vmem [shape: bf16[128,128], index: 3, kind: input, shape index: {}]   ;;  %s505_s4 = inlined_call_operand.vmem [shape: f32[128,128], index: 4, kind: output, shape index: {}]  }
   0x1 LB: > { %s377_s16 = sadd.s32 4294967295, %s444_s15   ;;  %p381_p0 = scmp.ge.s32.totalorder %s444_s15, 1  ;;  %s444_s15 = sphi %s471_s15, %s14_s15  }
   0x2   : > { %p174_p1 = scmp.lt.s32.totalorder %s444_s15, 3 }
   0x4   : > { %p175_p2 = pnand %p381_p0, %p174_p1 }
   0x5   : > { %s382_s17 = sshll.u32 (!%p175_p2), %s377_s16, 3  ;;  %v388_v0 = vld [vmem:[%s502_s1] ss:$0 sm:$0xff] (!%p175_p2) }
   0x6   : > { %178 = sbr.rel (%p175_p2) target bundleno = 36 (0x24), region = 36  ;;  %p206_p3 = scmp.lt.s32.totalorder (!%p175_p2), %s382_s17, 15  ;;  %v389_v11 = vld [vmem:[%s503_s2] ss:$0 sm:$0xff] (!%p175_p2) }
   0xd   : > { %s507_s17 = smov (!%p206_p3, %s382_s17), 15 }
   0xe   : > { %s383_s18 = sshll.u32 %s507_s17, 2  ;;  %s387_s29 = sshll.u32 %s507_s17, 3 }
   0xf   : > { %s209_s21 = scalar_lea.vmem %s501_s0, %s383_s18  ;;  %s215_s24 = scalar_lea.vmem %s504_s3, %s383_s18 }
  0x10   : > { %v393_v1 = vld [vmem:[%s209_s21] sm:$0xff]   ;;  %v424_v3 = vld [vmem:[%s209_s21 + $0x8] sm:$0xff]   ;;  %v425_v9 = vld [vmem:[%s209_s21 + $0x10] sm:$0xff]   ;;  %s221_s6 = scalar_lea.vmem %s505_s4, %s387_s29 }
  0x11   : > { %v409_v2 = vld [vmem:[%s215_s24] sm:$0xff]   ;;  %v394_v4 = vunpack.c.l.bf16 %v393_v1  ;;  %v395_v6 = vunpack.c.h.bf16 %v393_v1  ;;  %v427_v8 = vld [vmem:[%s215_s24 + $0x8] sm:$0xff]   ;;  %v428_v10 = vld [vmem:[%s215_s24 + $0x10] sm:$0xff]   ;;  %v398_v12 = vunpack.c.l.bf16 %v424_v3  ;;  %v399_v14 = vunpack.c.h.bf16 %v424_v3 }
  0x12   : > { %v410_v5 = vunpack.c.l.bf16 %v409_v2  ;;  %v411_v7 = vunpack.c.h.bf16 %v409_v2  ;;  %v414_v13 = vunpack.c.l.bf16 %v427_v8  ;;  %v415_v15 = vunpack.c.h.bf16 %v427_v8  ;;  %v426_v16 = vld [vmem:[%s209_s21 + $0x18] sm:$0xff]  }
  0x13   : > { %v262_v17 = vmul.f32 %v394_v4, %v388_v0  ;;  %v263_v18 = vmul.f32 %v395_v6, %v388_v0  ;;  %v402_v19 = vunpack.c.l.bf16 %v425_v9  ;;  %v418_v20 = vunpack.c.l.bf16 %v428_v10  ;;  %v429_v21 = vld [vmem:[%s215_s24 + $0x18] sm:$0xff]  }
  0x14   : > { %v264_v22 = vmul.f32 %v398_v12, %v388_v0  ;;  %v265_v23 = vmul.f32 %v399_v14, %v388_v0  ;;  %v403_v24 = vunpack.c.h.bf16 %v425_v9  ;;  %v419_v25 = vunpack.c.h.bf16 %v428_v10 }
  0x15   : > { %v277_v26 = vadd.f32 %v389_v11, %v262_v17  ;;  %v278_v27 = vadd.f32 %v389_v11, %v263_v18  ;;  %v266_v28 = vmul.f32 %v402_v19, %v388_v0  ;;  %v406_v29 = vunpack.c.l.bf16 %v426_v16 }
  0x16   : > { %v279_v30 = vadd.f32 %v389_v11, %v264_v22  ;;  %v280_v31 = vadd.f32 %v389_v11, %v265_v23  ;;  %v267_v32 = vmul.f32 %v403_v24, %v388_v0  ;;  %v422_v33 = vunpack.c.l.bf16 %v429_v21 }
  0x17   : > { %v285_v34 = vadd.f32 %v410_v5, %v277_v26  ;;  %v286_v35 = vadd.f32 %v411_v7, %v278_v27  ;;  %v281_v36 = vadd.f32 %v389_v11, %v266_v28  ;;  %v268_v37 = vmul.f32 %v406_v29, %v388_v0 }
  0x18   : > { %v287_v38 = vadd.f32 %v414_v13, %v279_v30  ;;  %v288_v39 = vadd.f32 %v415_v15, %v280_v31  ;;  %v282_v40 = vadd.f32 %v389_v11, %v267_v32  ;;  %v407_v41 = vunpack.c.h.bf16 %v426_v16 }
  0x19   : > { %v293_v42 = vmax.f32 %v285_v34, 0.0  ;;  %v294_v43 = vmax.f32 %v286_v35, 0.0  ;;  %v289_v44 = vadd.f32 %v418_v20, %v281_v36  ;;  %v283_v45 = vadd.f32 %v389_v11, %v268_v37 }
  0x1a   : > { %v295_v46 = vmax.f32 %v287_v38, 0.0  ;;  %v296_v47 = vmax.f32 %v288_v39, 0.0  ;;  %v290_v48 = vadd.f32 %v419_v25, %v282_v40  ;;  %v423_v51 = vunpack.c.h.bf16 %v429_v21 }
  0x1b   : > { %301 = vst [vmem:[%s221_s6] sm:$0xff] %v293_v42  ;;  %302 = vst [vmem:[%s221_s6 + $0x8] sm:$0xff] %v294_v43  ;;  %v297_v49 = vmax.f32 %v289_v44, 0.0  ;;  %v291_v50 = vadd.f32 %v422_v33, %v283_v45  ;;  %v269_v52 = vmul.f32 %v407_v41, %v388_v0 }
  0x1c   : > { %303 = vst [vmem:[%s221_s6 + $0x10] sm:$0xff] %v295_v46  ;;  %304 = vst [vmem:[%s221_s6 + $0x18] sm:$0xff] %v296_v47  ;;  %v298_v53 = vmax.f32 %v290_v48, 0.0 }
  0x1d   : > { %305 = vst [vmem:[%s221_s6 + $0x20] sm:$0xff] %v297_v49  ;;  %v299_v54 = vmax.f32 %v291_v50, 0.0  ;;  %v284_v55 = vadd.f32 %v389_v11, %v269_v52 }
  0x1e   : > { %306 = vst [vmem:[%s221_s6 + $0x28] sm:$0xff] %v298_v53 }
  0x1f   : > { %307 = vst [vmem:[%s221_s6 + $0x30] sm:$0xff] %v299_v54  ;;  %v292_v56 = vadd.f32 %v423_v51, %v284_v55 }
  0x21   : > { %v300_v57 = vmax.f32 %v292_v56, 0.0 }
  0x23   : > { %308 = vst [vmem:[%s221_s6 + $0x38] sm:$0xff] %v300_v57 }
  0x24 PF: > { %s14_s15 = sadd.s32 1, %s444_s15  }
  0x25   : > { %p11_p4 = scmp.ge.s32.totalorder %s14_s15, 4  }
  0x27   :  { %13 = sbr.rel (!%p11_p4) target bundleno = 1 (0x1), region = 69 }

</bundles_post_ra>
